<compile_context>
chip_gen: v7x
topology: tpu7x:2x2x1
jax: 0.10.0
libtpu: 0.0.40
codegen_flags: <defaults>
</compile_context>

<pallas_src>
import functools

import jax
import jax.numpy as jnp
from jax import lax
from jax.experimental import pallas as pl
from jax.experimental.pallas import tpu as pltpu


def _round_up(x, m):
    return (x + m - 1) // m * m


def _kipfblock_kernel(l_ref, c_ref, c2_ref, x_ref, wflat_ref, b_ref, o_ref, *, K, F_IN):
    """Fused ChebConv(K) + bias + ReLU (eval-mode dropout = identity).

    l_ref  : (N, N)       bf16  L_hat            == T_1(L_hat)
    c_ref  : (N, N)       bf16  C  = 2 L^2 - I   == T_2(L_hat)
    c2_ref : (N, N)       bf16  C2 = 2 C^2 - I   == T_4(L_hat)
    x_ref  : (N, F_IN)    bf16  node features.
    wflat  : (K*F_IN, Hp) bf16  flattened/padded ChebConv weights.
    b_ref  : (1, Hp)      f32   bias (zero-padded).
    o_ref  : (N, Hp)      f32   output.
    """
    x_bf = x_ref[...]

    tb = [None] * K            # bf16 copies: MXU operands / projection slab pieces
    tf = [None] * K            # f32 copies: recurrence subtrahends
    tb[0] = x_bf               # T_0 = X

    if K > 1:                  # T_1 = L X
        tf[1] = jnp.dot(l_ref[...], x_bf, preferred_element_type=jnp.float32)
        tb[1] = tf[1].astype(jnp.bfloat16)

    if K > 2:
        # One wide matmul: C @ [X | T_1]  ->  T_2 = C X ,  T_3 = 2 C T_1 - T_1
        c_bf = c_ref[...]
        rhs = jnp.concatenate([x_bf, tb[1]], axis=1) if K > 3 else x_bf
        s = jnp.dot(c_bf, rhs, preferred_element_type=jnp.float32)
        tf[2] = s[:, :F_IN]
        tb[2] = tf[2].astype(jnp.bfloat16)
        if K > 3:
            tf[3] = 2.0 * s[:, F_IN:2 * F_IN] - tf[1]
            tb[3] = tf[3].astype(jnp.bfloat16)

    if K > 4:
        # One wide matmul: C2 @ [X | T_1 | T_2 | T_3]
        #   T_4 = C2 X ;  T_{4+j} = 2 C2 T_j - T_{4-j}   (2 T_4 T_j = T_{4+j} + T_{4-j})
        c2_bf = c2_ref[...]
        n_need = min(K - 4, 4)
        pieces = [x_bf, tb[1], tb[2], tb[3]][:n_need]
        rhs = jnp.concatenate(pieces, axis=1) if n_need > 1 else pieces[0]
        r = jnp.dot(c2_bf, rhs, preferred_element_type=jnp.float32)
        tf[4] = r[:, :F_IN]
        tb[4] = tf[4].astype(jnp.bfloat16)
        if K > 5:
            tf[5] = 2.0 * r[:, F_IN:2 * F_IN] - tf[3]
            tb[5] = tf[5].astype(jnp.bfloat16)
        if K > 6:
            tf[6] = 2.0 * r[:, 2 * F_IN:3 * F_IN] - tf[2]
            tb[6] = tf[6].astype(jnp.bfloat16)
        if K > 7:
            tf[7] = 2.0 * r[:, 3 * F_IN:4 * F_IN] - tf[1]
            tb[7] = tf[7].astype(jnp.bfloat16)

    if K > 8:
        # Generic tail, batched in chunks of 4:  T_k = 2 C2 T_{k-4} - T_{k-8}  (k >= 8).
        tf[0] = x_bf.astype(jnp.float32)
        for kk in range(8, K, 4):                      # K static -> fully unrolled
            m = min(4, K - kk)
            rhs = (jnp.concatenate(tb[kk - 4:kk - 4 + m], axis=1)
                   if m > 1 else tb[kk - 4])
            r = jnp.dot(c2_bf, rhs, preferred_element_type=jnp.float32)
            for j in range(m):
                k = kk + j
                tf[k] = 2.0 * r[:, j * F_IN:(j + 1) * F_IN] - tf[k - 8]
                tb[k] = tf[k].astype(jnp.bfloat16)

    # Fused projection: (N, K*F_IN) @ (K*F_IN, H_pad), bf16 operands, f32 accumulation.
    # The slab is assembled in registers (no VMEM scratch round trip).
    slab = jnp.concatenate(tb, axis=1) if K > 1 else tb[0]
    acc = jnp.dot(slab, wflat_ref[...], preferred_element_type=jnp.float32)
    acc = acc + b_ref[...]                             # (1, H_pad) broadcasts over nodes
    # ReLU; dropout(p) with training=False (eval) is the identity.
    o_ref[...] = jnp.maximum(acc, 0.0).astype(o_ref.dtype)


def precompute_graph_operators(edge_index, num_nodes):
    """Graph-static precompute (call once per graph and cache across forwards).

    Returns f32 L_hat = -D^-1/2 A D^-1/2, C = T_2(L_hat), C2 = T_4(L_hat).
    """
    src = edge_index[0]
    dst = edge_index[1]
    a = jnp.zeros((num_nodes, num_nodes), jnp.float32)
    a = a.at[dst, src].add(1.0)                        # message flows source j -> target i
    deg = a.sum(axis=1)
    dinv_sqrt = jnp.where(deg > 0.0, lax.rsqrt(deg), 0.0)
    lhat = -(dinv_sqrt[:, None] * a * dinv_sqrt[None, :])
    eye = jnp.eye(num_nodes, dtype=jnp.float32)
    cheb2 = 2.0 * (lhat @ lhat) - eye
    cheb4 = 2.0 * (cheb2 @ cheb2) - eye
    return lhat, cheb2, cheb4


def _vmem_budget_bytes(n, f_in, k, h_pad):
    """Generation-aware scoped-VMEM budget for the resident-operator design."""
    resident = (3 * n * n * 2            # L, C, C2 (bf16)
                + n * f_in * 2           # x (bf16)
                + k * f_in * h_pad * 2   # W_flat (bf16)
                + h_pad * 4              # bias (f32)
                + n * h_pad * 4)         # output (f32)
    try:
        cap = int(pltpu.get_tpu_info().vmem_capacity_bytes)   # 128 MiB v5e/v6e, 64 MiB v7x
    except Exception:
        cap = 64 * 1024 * 1024           # conservative fallback: v7x per-TensorCore VMEM
    want = int(resident * 1.5) + (16 << 20)                   # Mosaic internal-scratch headroom
    return max(32 << 20, min(want, cap - (4 << 20)))


@jax.jit
def kipfblock_forward(x, lhat, cheb2, cheb4, w, b):
    """x: (N,F_in) f32, lhat/cheb2/cheb4: (N,N) f32 (graph-static), w: (K,F_in,H), b: (H,)."""
    n, f_in = x.shape
    k, _, h = w.shape
    h_pad = _round_up(h, 128)                          # lane-dense output (unmasked stores)

    # Flatten the K per-order weights into one (K*F_in, H_pad) bf16 MXU operand;
    # row index k*F_in + f  <->  W[k, f, :].
    w_flat = jnp.pad(w.reshape(k * f_in, h), ((0, 0), (0, h_pad - h)))
    b_pad = jnp.pad(b, (0, h_pad - h)).reshape(1, h_pad)

    kernel = functools.partial(_kipfblock_kernel, K=k, F_IN=f_in)
    vspec = pl.BlockSpec(memory_space=pltpu.MemorySpace.VMEM)
    out = pl.pallas_call(
        kernel,
        out_shape=jax.ShapeDtypeStruct((n, h_pad), jnp.float32),
        in_specs=[vspec] * 6,
        out_specs=vspec,
        compiler_params=pltpu.CompilerParams(
            vmem_limit_bytes=_vmem_budget_bytes(n, f_in, k, h_pad)),
    )(
        lhat.astype(jnp.bfloat16),
        cheb2.astype(jnp.bfloat16),
        cheb4.astype(jnp.bfloat16),
        x.astype(jnp.bfloat16),                        # x only ever consumed as bf16
        w_flat.astype(jnp.bfloat16),
        b_pad,
    )
    # Consumer-facing (N, H); the padded (N, 128) slab stays lane-dense inside the kernel.
    return out[:, :h]


def _reference_f32(x, lhat, w, b):
    """Plain-JAX f32 ChebConv (standard recurrence) + bias + ReLU (eval dropout = id)."""
    k_hops = w.shape[0]
    t0 = x
    out = t0 @ w[0]
    if k_hops > 1:
        t1 = lhat @ x
        out = out + t1 @ w[1]
        for k in range(2, k_hops):
            t2 = 2.0 * (lhat @ t1) - t0
            out = out + t2 @ w[k]
            t0, t1 = t1, t2
    return jnp.maximum(out + b[None, :], 0.0)


def _reference_matched(x, lhat, cheb2, cheb4, w, b):
    """Mirrors the kernel's numerics (bf16 MXU operands, f32 accumulation, batched
    C / C2 recurrence, fused 128-deep projection) for a tight check."""
    k_hops, f_in, h = w.shape
    bf = jnp.bfloat16
    l_bf, c_bf, c2_bf = lhat.astype(bf), cheb2.astype(bf), cheb4.astype(bf)
    x_bf = x.astype(bf)
    tb = [None] * k_hops
    tf = [None] * k_hops
    tb[0] = x_bf
    if k_hops > 1:
        tf[1] = jnp.dot(l_bf, x_bf, preferred_element_type=jnp.float32)
        tb[1] = tf[1].astype(bf)
    if k_hops > 2:
        tf[2] = jnp.dot(c_bf, x_bf, preferred_element_type=jnp.float32)
        tb[2] = tf[2].astype(bf)
    if k_hops > 3:
        tf[3] = 2.0 * jnp.dot(c_bf, tb[1], preferred_element_type=jnp.float32) - tf[1]
        tb[3] = tf[3].astype(bf)
    if k_hops > 4:
        tf[4] = jnp.dot(c2_bf, x_bf, preferred_element_type=jnp.float32)
        tb[4] = tf[4].astype(bf)
    if k_hops > 5:
        tf[5] = 2.0 * jnp.dot(c2_bf, tb[1], preferred_element_type=jnp.float32) - tf[3]
        tb[5] = tf[5].astype(bf)
    if k_hops > 6:
        tf[6] = 2.0 * jnp.dot(c2_bf, tb[2], preferred_element_type=jnp.float32) - tf[2]
        tb[6] = tf[6].astype(bf)
    if k_hops > 7:
        tf[7] = 2.0 * jnp.dot(c2_bf, tb[3], preferred_element_type=jnp.float32) - tf[1]
        tb[7] = tf[7].astype(bf)
    if k_hops > 8:
        tf[0] = x_bf.astype(jnp.float32)
        for k in range(8, k_hops):
            tf[k] = (2.0 * jnp.dot(c2_bf, tb[k - 4], preferred_element_type=jnp.float32)
                     - tf[k - 8])
            tb[k] = tf[k].astype(bf)
    slab = jnp.concatenate(tb, axis=1) if k_hops > 1 else tb[0]
    w_flat = w.reshape(k_hops * f_in, h).astype(bf)
    out = jnp.dot(slab, w_flat, preferred_element_type=jnp.float32) + b[None, :]
    return jnp.maximum(out, 0.0)


if __name__ == "__main__":
    # Small deterministic problem: N nodes, F_in input feats, H hidden, K hops.
    N, F_IN, HID, K = 64, 16, 64, 8

    key = jax.random.PRNGKey(0)
    kx, kw, kb = jax.random.split(key, 3)

    x = jax.random.normal(kx, (N, F_IN), dtype=jnp.float32)

    # Deterministic undirected ring + skip-2 graph (both directions present).
    i = jnp.arange(N, dtype=jnp.int32)
    src = jnp.concatenate([i, (i + 1) % N, i, (i + 2) % N])
    dst = jnp.concatenate([(i + 1) % N, i, (i + 2) % N, i])
    edge_index = jnp.stack([src, dst], axis=0)

    # Glorot-style deterministic init (ChebConv weight shape (K, F_in, H), bias (H,)).
    limit = (6.0 / (F_IN + HID)) ** 0.5
    w = jax.random.uniform(kw, (K, F_IN, HID), jnp.float32, -limit, limit)
    b = 0.1 * jax.random.normal(kb, (HID,), dtype=jnp.float32)

    # Graph-static precompute: run ONCE per graph, reused across forward calls.
    lhat, cheb2, cheb4 = precompute_graph_operators(edge_index, N)
    lhat, cheb2, cheb4 = jax.block_until_ready((lhat, cheb2, cheb4))

    out = kipfblock_forward(x, lhat, cheb2, cheb4, w, b)
    out = jax.block_until_ready(out)
    assert out.shape == (N, HID)

    # Tight check vs a reference with the same bf16/f32 numerics as the kernel.
    ref_matched = _reference_matched(x, lhat, cheb2, cheb4, w, b)
    assert jnp.allclose(out, ref_matched, atol=2e-2, rtol=1e-2), (
        "matched-precision mismatch, max abs diff = "
        f"{float(jnp.max(jnp.abs(out - ref_matched)))}")

    # Looser semantic check vs the full-f32 standard ChebConv recurrence
    # (bf16 MXU operands bound the achievable agreement).
    ref_f32 = _reference_f32(x, lhat, w, b)
    assert jnp.allclose(out, ref_f32, atol=0.2, rtol=0.05), (
        "f32 semantic mismatch, max abs diff = "
        f"{float(jnp.max(jnp.abs(out - ref_f32)))}")

    print("KERNEL_OK")
</pallas_src>

<mosaic_0001>
module attributes {stable_mosaic.version = 11 : i64} {
  func.func @_kipfblock_kernel(%arg0: memref<64x64xbf16, #tpu.memory_space<vmem>>, %arg1: memref<64x64xbf16, #tpu.memory_space<vmem>>, %arg2: memref<64x64xbf16, #tpu.memory_space<vmem>>, %arg3: memref<64x16xbf16, #tpu.memory_space<vmem>>, %arg4: memref<128x128xbf16, #tpu.memory_space<vmem>>, %arg5: memref<1x128xf32, #tpu.memory_space<vmem>>, %arg6: memref<64x128xf32, #tpu.memory_space<vmem>>) attributes {dimension_semantics = [], scalar_prefetch = 0 : i64, scratch_operands = 0 : i64, tpu.core_type = #tpu.core_type<tc>} {
    %c0 = arith.constant 0 : index
    %c0_0 = arith.constant 0 : index
    %0 = vector.load %arg3[%c0, %c0_0] : memref<64x16xbf16, #tpu.memory_space<vmem>>, vector<64x16xbf16>
    %c0_1 = arith.constant 0 : index
    %c0_2 = arith.constant 0 : index
    %1 = vector.load %arg0[%c0_1, %c0_2] : memref<64x64xbf16, #tpu.memory_space<vmem>>, vector<64x64xbf16>
    %cst = arith.constant dense<0.000000e+00> : vector<64x16xf32>
    %2 = tpu.matmul %1, %0, %cst {dimension_numbers = #tpu.dot_dimension_numbers<[1], [0], [0], [1], [0, 0, 1, 1], [], []>} : vector<64x64xbf16>, vector<64x16xbf16>, vector<64x16xf32> -> vector<64x16xf32>
    %3 = arith.truncf %2 : vector<64x16xf32> to vector<64x16xbf16>
    %c0_3 = arith.constant 0 : index
    %c0_4 = arith.constant 0 : index
    %4 = vector.load %arg1[%c0_3, %c0_4] : memref<64x64xbf16, #tpu.memory_space<vmem>>, vector<64x64xbf16>
    %5 = tpu.concatenate %0, %3 in 1 : vector<64x16xbf16>, vector<64x16xbf16> -> vector<64x32xbf16>
    %cst_5 = arith.constant dense<0.000000e+00> : vector<64x32xf32>
    %6 = tpu.matmul %4, %5, %cst_5 {dimension_numbers = #tpu.dot_dimension_numbers<[1], [0], [0], [1], [0, 0, 1, 1], [], []>} : vector<64x64xbf16>, vector<64x32xbf16>, vector<64x32xf32> -> vector<64x32xf32>
    %7 = vector.extract_strided_slice %6 {offsets = [0, 0], sizes = [64, 16], strides = [1, 1]} : vector<64x32xf32> to vector<64x16xf32>
    %8 = arith.truncf %7 : vector<64x16xf32> to vector<64x16xbf16>
    %9 = vector.extract_strided_slice %6 {offsets = [0, 16], sizes = [64, 16], strides = [1, 1]} : vector<64x32xf32> to vector<64x16xf32>
    %cst_6 = arith.constant 2.000000e+00 : f32
    %10 = vector.broadcast %cst_6 : f32 to vector<64x16xf32>
    %11 = arith.mulf %10, %9 : vector<64x16xf32>
    %12 = arith.subf %11, %2 : vector<64x16xf32>
    %13 = arith.truncf %12 : vector<64x16xf32> to vector<64x16xbf16>
    %c0_7 = arith.constant 0 : index
    %c0_8 = arith.constant 0 : index
    %14 = vector.load %arg2[%c0_7, %c0_8] : memref<64x64xbf16, #tpu.memory_space<vmem>>, vector<64x64xbf16>
    %15 = tpu.concatenate %0, %3, %8, %13 in 1 : vector<64x16xbf16>, vector<64x16xbf16>, vector<64x16xbf16>, vector<64x16xbf16> -> vector<64x64xbf16>
    %cst_9 = arith.constant dense<0.000000e+00> : vector<64x64xf32>
    %16 = tpu.matmul %14, %15, %cst_9 {dimension_numbers = #tpu.dot_dimension_numbers<[1], [0], [0], [1], [0, 0, 1, 1], [], []>} : vector<64x64xbf16>, vector<64x64xbf16>, vector<64x64xf32> -> vector<64x64xf32>
    %17 = vector.extract_strided_slice %16 {offsets = [0, 0], sizes = [64, 16], strides = [1, 1]} : vector<64x64xf32> to vector<64x16xf32>
    %18 = arith.truncf %17 : vector<64x16xf32> to vector<64x16xbf16>
    %19 = vector.extract_strided_slice %16 {offsets = [0, 16], sizes = [64, 16], strides = [1, 1]} : vector<64x64xf32> to vector<64x16xf32>
    %cst_10 = arith.constant 2.000000e+00 : f32
    %20 = vector.broadcast %cst_10 : f32 to vector<64x16xf32>
    %21 = arith.mulf %20, %19 : vector<64x16xf32>
    %22 = arith.subf %21, %12 : vector<64x16xf32>
    %23 = arith.truncf %22 : vector<64x16xf32> to vector<64x16xbf16>
    %24 = vector.extract_strided_slice %16 {offsets = [0, 32], sizes = [64, 16], strides = [1, 1]} : vector<64x64xf32> to vector<64x16xf32>
    %cst_11 = arith.constant 2.000000e+00 : f32
    %25 = vector.broadcast %cst_11 : f32 to vector<64x16xf32>
    %26 = arith.mulf %25, %24 : vector<64x16xf32>
    %27 = arith.subf %26, %7 : vector<64x16xf32>
    %28 = arith.truncf %27 : vector<64x16xf32> to vector<64x16xbf16>
    %29 = vector.extract_strided_slice %16 {offsets = [0, 48], sizes = [64, 16], strides = [1, 1]} : vector<64x64xf32> to vector<64x16xf32>
    %cst_12 = arith.constant 2.000000e+00 : f32
    %30 = vector.broadcast %cst_12 : f32 to vector<64x16xf32>
    %31 = arith.mulf %30, %29 : vector<64x16xf32>
    %32 = arith.subf %31, %2 : vector<64x16xf32>
    %33 = arith.truncf %32 : vector<64x16xf32> to vector<64x16xbf16>
    %34 = tpu.concatenate %0, %3, %8, %13, %18, %23, %28, %33 in 1 : vector<64x16xbf16>, vector<64x16xbf16>, vector<64x16xbf16>, vector<64x16xbf16>, vector<64x16xbf16>, vector<64x16xbf16>, vector<64x16xbf16>, vector<64x16xbf16> -> vector<64x128xbf16>
    %c0_13 = arith.constant 0 : index
    %c0_14 = arith.constant 0 : index
    %35 = vector.load %arg4[%c0_13, %c0_14] : memref<128x128xbf16, #tpu.memory_space<vmem>>, vector<128x128xbf16>
    %cst_15 = arith.constant dense<0.000000e+00> : vector<64x128xf32>
    %36 = tpu.matmul %34, %35, %cst_15 {dimension_numbers = #tpu.dot_dimension_numbers<[1], [0], [0], [1], [0, 0, 1, 1], [], []>} : vector<64x128xbf16>, vector<128x128xbf16>, vector<64x128xf32> -> vector<64x128xf32>
    %c0_16 = arith.constant 0 : index
    %c0_17 = arith.constant 0 : index
    %37 = vector.load %arg5[%c0_16, %c0_17] : memref<1x128xf32, #tpu.memory_space<vmem>>, vector<1x128xf32>
    %38 = vector.broadcast %37 : vector<1x128xf32> to vector<64x128xf32>
    %39 = arith.addf %36, %38 : vector<64x128xf32>
    %cst_18 = arith.constant 0.000000e+00 : f32
    %40 = vector.broadcast %cst_18 : f32 to vector<64x128xf32>
    %41 = arith.maximumf %39, %40 : vector<64x128xf32>
    %c0_19 = arith.constant 0 : index
    %c0_20 = arith.constant 0 : index
    %42 = vector.load %arg6[%c0_19, %c0_20] : memref<64x128xf32, #tpu.memory_space<vmem>>, vector<64x128xf32>
    tpu.vector_store %arg6[%c0_19, %c0_20], %41 {strides = array<i32>} : memref<64x128xf32, #tpu.memory_space<vmem>>, vector<64x128xf32>,
    return
  }
}

</mosaic_0001>

<bundles_post_ra>
// kernel: kipfblock_forward.1
= control target key start
LH: loop header
LB: loop body
LE: loop exit
PB: predicated region body
PF: predicated region fallthrough
CT: control target
= control target key end

     0   :  { %vm85_vm0 = vcmask 523264   ;;  %s1388_s0 = inlined_call_operand.vmem [shape: bf16[64,64], index: 0, kind: input, shape index: {}]   ;;  %s1389_s1 = inlined_call_operand.vmem [shape: bf16[64,64], index: 1, kind: input, shape index: {}]   ;;  %s1390_s2 = inlined_call_operand.vmem [shape: bf16[64,64], index: 2, kind: input, shape index: {}]   ;;  %s1391_s3 = inlined_call_operand.vmem [shape: bf16[64,16], index: 3, kind: input, shape index: {}]   ;;  %s1392_s4 = inlined_call_operand.vmem [shape: bf16[128,128], index: 4, kind: input, shape index: {}]   ;;  %s1393_s5 = inlined_call_operand.vmem [shape: f32[1,128], index: 5, kind: input, shape index: {}]   ;;  %s1394_s6 = inlined_call_operand.hbm [shape: f32[64,128], index: 6, kind: output, shape index: {}]  }
   0x1   :  { %v1019_v0 = vld [vmem:[%s1391_s3] sm:$0xff]   ;;  %v1020_v1 = vld [vmem:[%s1391_s3 + $0x8] sm:$0xff]   ;;  %v1021_v2 = vld [vmem:[%s1391_s3 + $0x10] sm:$0xff]  }
   0x2   :  { %940 = vmatprep.subr.bf16.mxu0 %v1019_v0  ;;  %v1023_v3 = vld [vmem:[%s1388_s0] sm:$0xff]   ;;  %v1022_v4 = vld [vmem:[%s1391_s3 + $0x18] sm:$0xff]   ;;  %v1024_v5 = vld [vmem:[%s1388_s0 + $0x8] sm:$0xff]  }
   0x3   :  { %941 = vmatpush3.bf16.msra.mxu0 %v1019_v0  ;;  %948 = vmatprep.mubr.msk.bf16.mxu0 %vm85_vm0, %v1023_v3  ;;  %v1025_v6 = vld [vmem:[%s1388_s0 + $0x10] sm:$0xff]  }
   0x4   :  { %942 = vmatprep.subr.bf16.mxu0 %v1020_v1 }
   0x7   :  { %943 = vmatpush3.bf16.msra.mxu0 %v1020_v1 }
   0x8   :  { %944 = vmatprep.subr.bf16.mxu0 %v1021_v2 }
   0xb   :  { %945 = vmatpush3.bf16.msra.mxu0 %v1021_v2 }
   0xc   :  { %946 = vmatprep.subr.bf16.mxu0 %v1022_v4 }
   0xf   :  { %947 = vmatpush3.bf16.msra.mxu0 %v1022_v4 }
  0x12   :  { %949 = vmatmul.mubr.msk.bf16.vlgmr.msra.gmra.mrb[0].mxu0 %vm85_vm0, %v1024_v5 }
  0x13   :  { %11 = vsyncpa [#allocation3], 0  ;;  %952 = vmatprep.mubr.msk.bf16.mxu0 %vm85_vm0, %v1025_v6  ;;  %v1026_v7 = vld [vmem:[%s1388_s0 + $0x18] sm:$0xff]   ;;  %s1067_s3 = smov 16   ;;  %v1027_v14 = vld [vmem:[%s1389_s1] sm:$0xff]   ;;  %vm187_vm1 = vcmask 130048  }
  0x14   :  { %964 = vmatprep.mubr.msk.bf16.mxu1 %vm85_vm0, %v1027_v14  ;;  %v1028_v29 = vld [vmem:[%s1389_s1 + $0x8] sm:$0xff]   ;;  %v1029_v30 = vld [vmem:[%s1389_s1 + $0x10] sm:$0xff]   ;;  %v1030_v31 = vld [vmem:[%s1389_s1 + $0x18] sm:$0xff]   ;;  %s1068_s1 = smov 32   ;;  %s1069_s22 = smov 48   ;;  %vm389_vm2 = vcmask 261120  }
  0x15   :  { %v1031_v59 = vld [vmem:[%s1390_s2] sm:$0xff]   ;;  %vm398_vm3 = vcmask 392192   ;;  %s1070_s18 = smov 64   ;;  %vm668_vm4 = vcmask 654336   ;;  %vm677_vm5 = vcmask 785408   ;;  %vm686_vm6 = vcmask 916480  }
  0x1a   :  { %953 = vmatmul.mubr.msk.bf16.gmra.mrb[4].mxu0 %vm85_vm0, %v1026_v7 }
  0x1b   :  { %980 = vmatprep.mubr.msk.bf16.mxu0 %vm85_vm0, %v1031_v59 }
  0xe5   :  { %v1137_v8 = vpop.f32.mrb[0].mxu0 }
  0xe6   :  { %v1139_v9 = vpop.f32.mrb[1].mxu0 }
  0xe7   :  { %v1141_v10 = vpop.f32.mrb[2].mxu0 }
  0xe8   :  { %v164_v11 = vpack.c.bf16 %v1141_v10, %v1137_v8  ;;  %v1145_v12 = vpop.f32.mrb[3].mxu0 }
  0xe9   :  { %v163_v13 = vpack.c.bf16 %v1145_v12, %v1139_v9 }
  0xeb   :  { %179 = vrot.lane.b32.xlu0 %v163_v13, %s1067_s3 }
  0xed   :  { %v1152_v15 = vpop.f32.mrb[4].mxu0 }
  0xee   :  { %v1154_v16 = vpop.f32.mrb[5].mxu0 }
  0xef   :  { %181 = vrot.lane.b32.xlu0 %v164_v11, %s1067_s3  ;;  %v1157_v17 = vpop.f32.mrb[6].mxu0 }
  0xf0   :  { %v166_v18 = vpack.c.bf16 %v1157_v17, %v1152_v15  ;;  %v1161_v19 = vpop.f32.mrb[7].mxu0 }
  0xf1   :  { %v165_v20 = vpack.c.bf16 %v1161_v19, %v1154_v16 }
  0xf3   :  { %321 = vrot.lane.b32.xlu0 %v1139_v9, %s1067_s3  ;;  %183 = vrot.lane.b32.xlu1 %v165_v20, %s1067_s3 }
  0xf7   :  { %325 = vrot.lane.b32.xlu0 %v1137_v8, %s1067_s3  ;;  %185 = vrot.lane.b32.xlu1 %v166_v18, %s1067_s3 }
  0xfb   :  { %329 = vrot.lane.b32.xlu0 %v1154_v16, %s1067_s3  ;;  %323 = vrot.lane.b32.xlu1 %v1145_v12, %s1067_s3 }
  0xff   :  { %333 = vrot.lane.b32.xlu0 %v1152_v15, %s1067_s3  ;;  %327 = vrot.lane.b32.xlu1 %v1141_v10, %s1067_s3 }
 0x103   :  { %331 = vrot.lane.b32.xlu1 %v1161_v19, %s1067_s3 }
 0x107   :  { %335 = vrot.lane.b32.xlu1 %v1157_v17, %s1067_s3 }
 0x15d   :  { %v180_v21 = vpop.permute.xlu0 %179 }
 0x15e   :  { %v1173_v22 = vsel %vm187_vm1, %v1019_v0, %v180_v21 }
 0x15f   :  { %956 = vmatprep.subr.bf16.mxu1 %v1173_v22 }
 0x160   :  { %957 = vmatpush3.bf16.msra.mxu1 %v1173_v22 }
 0x161   :  { %v182_v23 = vpop.permute.xlu0 %181 }
 0x162   :  { %v1177_v24 = vsel %vm187_vm1, %v1020_v1, %v182_v23 }
 0x163   :  { %958 = vmatprep.subr.bf16.mxu1 %v1177_v24 }
 0x164   :  { %959 = vmatpush3.bf16.msra.mxu1 %v1177_v24 }
 0x165   :  { %v184_v25 = vpop.permute.xlu1 %183  ;;  %v322_v33 = vpop.permute.xlu0 %321 }
 0x166   :  { %v1181_v26 = vsel %vm187_vm1, %v1021_v2, %v184_v25  ;;  %v1032_v25 = vld [vmem:[%s1390_s2 + $0x8] sm:$0xff]  }
 0x167   :  { %960 = vmatprep.subr.bf16.mxu1 %v1181_v26 }
 0x168   :  { %961 = vmatpush3.bf16.msra.mxu1 %v1181_v26 }
 0x169   :  { %v186_v27 = vpop.permute.xlu1 %185  ;;  %v326_v44 = vpop.permute.xlu0 %325 }
 0x16a   :  { %v1185_v28 = vsel %vm187_vm1, %v1022_v4, %v186_v27  ;;  %v1034_v27 = vld [vmem:[%s1390_s2 + $0x18] sm:$0xff]  }
 0x16b   :  { %962 = vmatprep.subr.bf16.mxu1 %v1185_v28 }
 0x16c   :  { %963 = vmatpush3.bf16.msra.mxu1 %v1185_v28 }
 0x16d   :  { %v324_v32 = vpop.permute.xlu1 %323  ;;  %v330_v56 = vpop.permute.xlu0 %329 }
 0x16f   :  { %965 = vmatmul.mubr.msk.bf16.vlgmr.msra.gmra.mrb[0].mxu1 %vm85_vm0, %v1028_v29  ;;  %v1036_v29 = vld [vmem:[%s1392_s4 + $0x8] sm:$0xff]  }
 0x170   :  { %968 = vmatprep.mubr.msk.bf16.mxu1 %vm85_vm0, %v1029_v30  ;;  %v1037_v30 = vld [vmem:[%s1392_s4 + $0x10] sm:$0xff]  }
 0x171   :  { %v328_v38 = vpop.permute.xlu1 %327  ;;  %v334_v6 = vpop.permute.xlu0 %333 }
 0x175   :  { %v332_v51 = vpop.permute.xlu1 %331 }
 0x177   :  { %969 = vmatmul.mubr.msk.bf16.gmra.mrb[4].mxu1 %vm85_vm0, %v1030_v31  ;;  %v1038_v31 = vld [vmem:[%s1392_s4 + $0x18] sm:$0xff]  }
 0x179   :  { %v336_v3 = vpop.permute.xlu1 %335 }
 0x242   :  { %v966_v34 = vpop.f32.mrb[0].mxu1 }
 0x243   :  { %v270_v35 = vpop.f32.mrb[1].mxu1  ;;  %v307_v45 = vmul.f32 2.0, %v966_v34 }
 0x244   :  { %v305_v36 = vmul.f32 2.0, %v270_v35  ;;  %v967_v37 = vpop.f32.mrb[2].mxu1 }
 0x245   :  { %v302_v39 = vpack.c.bf16 %v967_v37, %v966_v34  ;;  %v273_v40 = vpop.f32.mrb[3].mxu1  ;;  %v308_v41 = vmul.f32 2.0, %v967_v37  ;;  %v1210_v53 = vsub.f32 %v307_v45, %v326_v44  ;;  %v1041_v44 = vld [vmem:[%s1392_s4 + $0x30] sm:$0xff]  }
 0x246   :  { %v301_v42 = vpack.c.bf16 %v273_v40, %v270_v35  ;;  %v306_v43 = vmul.f32 2.0, %v273_v40  ;;  %v1201_v46 = vsub.f32 %v305_v36, %v322_v33 }
 0x247   :  { %v1206_v48 = vsub.f32 %v308_v41, %v328_v38 }
 0x248   :  { %v1203_v47 = vsub.f32 %v306_v43, %v324_v32  ;;  %369 = vrot.lane.b32.xlu0 %v301_v42, %s1068_s1  ;;  %v1039_v32 = vld [vmem:[%s1392_s4 + $0x20] sm:$0xff]   ;;  %v1040_v42 = vld [vmem:[%s1392_s4 + $0x28] sm:$0xff]  }
 0x249   :  { %v354_v63 = vpack.c.bf16 %v1206_v48, %v1210_v53 }
 0x24a   :  { %v970_v49 = vpop.f32.mrb[4].mxu1  ;;  %v353_v50 = vpack.c.bf16 %v1203_v47, %v1201_v46 }
 0x24b   :  { %v286_v52 = vpop.f32.mrb[5].mxu1  ;;  %v311_v0 = vmul.f32 2.0, %v970_v49 }
 0x24c   :  { %v309_v54 = vmul.f32 2.0, %v286_v52  ;;  %371 = vrot.lane.b32.xlu0 %v302_v39, %s1068_s1  ;;  %v971_v55 = vpop.f32.mrb[6].mxu1  ;;  %381 = vrot.lane.b32.xlu1 %v353_v50, %s1068_s1 }
 0x24d   :  { %v304_v57 = vpack.c.bf16 %v971_v55, %v970_v49  ;;  %v289_v58 = vpop.f32.mrb[7].mxu1  ;;  %v312_v60 = vmul.f32 2.0, %v971_v55  ;;  %v1230_v7 = vsub.f32 %v311_v0, %v334_v6 }
 0x24e   :  { %v303_v61 = vpack.c.bf16 %v289_v58, %v286_v52  ;;  %v310_v62 = vmul.f32 2.0, %v289_v58  ;;  %v1220_v1 = vsub.f32 %v309_v54, %v330_v56  ;;  %v1042_v54 = vld [vmem:[%s1392_s4 + $0x38] sm:$0xff]  }
 0x24f   :  { %v1226_v4 = vsub.f32 %v312_v60, %v336_v3 }
 0x250   :  { %v1222_v2 = vsub.f32 %v310_v62, %v332_v51  ;;  %373 = vrot.lane.b32.xlu0 %v303_v61, %s1068_s1  ;;  %383 = vrot.lane.b32.xlu1 %v354_v63, %s1068_s1 }
 0x251   :  { %v356_v11 = vpack.c.bf16 %v1226_v4, %v1230_v7 }
 0x252   :  { %v355_v5 = vpack.c.bf16 %v1222_v2, %v1220_v1 }
 0x254   :  { %375 = vrot.lane.b32.xlu0 %v304_v57, %s1068_s1  ;;  %385 = vrot.lane.b32.xlu1 %v355_v5, %s1068_s1 }
 0x258   :  { %540 = vrot.lane.b32.xlu0 %v270_v35, %s1068_s1  ;;  %387 = vrot.lane.b32.xlu1 %v356_v11, %s1068_s1 }
 0x25c   :  { %544 = vrot.lane.b32.xlu0 %v966_v34, %s1068_s1  ;;  %542 = vrot.lane.b32.xlu1 %v273_v40, %s1068_s1 }
 0x260   :  { %576 = vrot.lane.b32.xlu0 %v1139_v9, %s1069_s22  ;;  %546 = vrot.lane.b32.xlu1 %v967_v37, %s1068_s1 }
 0x264   :  { %580 = vrot.lane.b32.xlu0 %v1137_v8, %s1069_s22  ;;  %578 = vrot.lane.b32.xlu1 %v1145_v12, %s1069_s22 }
 0x268   :  { %548 = vrot.lane.b32.xlu0 %v286_v52, %s1068_s1  ;;  %582 = vrot.lane.b32.xlu1 %v1141_v10, %s1069_s22 }
 0x26c   :  { %552 = vrot.lane.b32.xlu0 %v970_v49, %s1068_s1  ;;  %550 = vrot.lane.b32.xlu1 %v289_v58, %s1068_s1 }
 0x270   :  { %584 = vrot.lane.b32.xlu0 %v1154_v16, %s1069_s22  ;;  %554 = vrot.lane.b32.xlu1 %v971_v55, %s1068_s1 }
 0x274   :  { %588 = vrot.lane.b32.xlu0 %v1152_v15, %s1069_s22  ;;  %586 = vrot.lane.b32.xlu1 %v1161_v19, %s1069_s22 }
 0x278   :  { %590 = vrot.lane.b32.xlu1 %v1157_v17, %s1069_s22 }
 0x2ba   :  { %v370_v8 = vpop.permute.xlu0 %369 }
 0x2bb   :  { %v391_v9 = vsel %vm389_vm2, %v1173_v22, %v370_v8 }
 0x2be   :  { %v372_v10 = vpop.permute.xlu0 %371  ;;  %v382_v12 = vpop.permute.xlu1 %381 }
 0x2bf   :  { %v1256_v13 = vsel %vm398_vm3, %v391_v9, %v382_v12  ;;  %v393_v14 = vsel %vm389_vm2, %v1177_v24, %v372_v10 }
 0x2c0   :  { %972 = vmatprep.subr.bf16.mxu0 %v1256_v13 }
 0x2c1   :  { %973 = vmatpush3.bf16.msra.mxu0 %v1256_v13 }
 0x2c2   :  { %v374_v15 = vpop.permute.xlu0 %373  ;;  %v384_v16 = vpop.permute.xlu1 %383 }
 0x2c3   :  { %v1263_v17 = vsel %vm398_vm3, %v393_v14, %v384_v16  ;;  %v395_v18 = vsel %vm389_vm2, %v1181_v26, %v374_v15  ;;  %v1033_v26 = vld [vmem:[%s1390_s2 + $0x10] sm:$0xff]  }
 0x2c4   :  { %974 = vmatprep.subr.bf16.mxu0 %v1263_v17 }
 0x2c5   :  { %975 = vmatpush3.bf16.msra.mxu0 %v1263_v17 }
 0x2c6   :  { %v386_v19 = vpop.permute.xlu1 %385  ;;  %v376_v20 = vpop.permute.xlu0 %375 }
 0x2c7   :  { %v1270_v21 = vsel %vm398_vm3, %v395_v18, %v386_v19  ;;  %v397_v22 = vsel %vm389_vm2, %v1185_v28, %v376_v20  ;;  %v1035_v28 = vld [vmem:[%s1392_s4] sm:$0xff]  }
 0x2c8   :  { %976 = vmatprep.subr.bf16.mxu0 %v1270_v21  ;;  %988 = vmatprep.subr.bf16.mxu1 %v1035_v28 }
 0x2c9   :  { %977 = vmatpush3.bf16.msra.mxu0 %v1270_v21  ;;  %989 = vmatpush3.bf16.msra.mxu1 %v1035_v28 }
 0x2ca   :  { %v388_v23 = vpop.permute.xlu1 %387  ;;  %990 = vmatprep.subr.bf16.mxu1 %v1036_v29  ;;  %v541_v33 = vpop.permute.xlu0 %540 }
 0x2cb   :  { %v1277_v24 = vsel %vm398_vm3, %v397_v22, %v388_v23 }
 0x2cc   :  { %978 = vmatprep.subr.bf16.mxu0 %v1277_v24 }
 0x2cd   :  { %979 = vmatpush3.bf16.msra.mxu0 %v1277_v24  ;;  %991 = vmatpush3.bf16.msra.mxu1 %v1036_v29 }
 0x2ce   :  { %992 = vmatprep.subr.bf16.mxu1 %v1037_v30  ;;  %v543_v34 = vpop.permute.xlu1 %542  ;;  %v545_v35 = vpop.permute.xlu0 %544 }
 0x2d0   :  { %981 = vmatmul.mubr.msk.bf16.vlgmr.msra.gmra.mrb[8].mxu0 %vm85_vm0, %v1032_v25 }
 0x2d1   :  { %984 = vmatprep.mubr.msk.bf16.mxu0 %vm85_vm0, %v1033_v26  ;;  %993 = vmatpush3.bf16.msra.mxu1 %v1037_v30 }
 0x2d2   :  { %994 = vmatprep.subr.bf16.mxu1 %v1038_v31  ;;  %v547_v36 = vpop.permute.xlu1 %546  ;;  %v577_v37 = vpop.permute.xlu0 %576 }
 0x2d5   :  { %995 = vmatpush3.bf16.msra.mxu1 %v1038_v31 }
 0x2d6   :  { %996 = vmatprep.subr.bf16.mxu1 %v1039_v32  ;;  %v579_v38 = vpop.permute.xlu1 %578  ;;  %v581_v39 = vpop.permute.xlu0 %580 }
 0x2d8   :  { %985 = vmatmul.mubr.msk.bf16.gmra.mrb[12].mxu0 %vm85_vm0, %v1034_v27 }
 0x2d9   :  { %997 = vmatpush3.bf16.msra.mxu1 %v1039_v32 }
 0x2da   :  { %v583_v40 = vpop.permute.xlu1 %582  ;;  %v1308_v41 = vpop.permute.xlu0 %548  ;;  %998 = vmatprep.subr.bf16.mxu1 %v1040_v42 }
 0x2dd   :  { %999 = vmatpush3.bf16.msra.mxu1 %v1040_v42 }
 0x2de   :  { %v1313_v43 = vpop.permute.xlu1 %550  ;;  %v1318_v45 = vpop.permute.xlu0 %552  ;;  %1000 = vmatprep.subr.bf16.mxu1 %v1041_v44 }
 0x2e1   :  { %1001 = vmatpush3.bf16.msra.mxu1 %v1041_v44 }
 0x2e2   :  { %v1320_v49 = vpop.permute.xlu1 %554  ;;  %1002 = vmatprep.subr.bf16.mxu1 %v1042_v54  ;;  %v585_v9 = vpop.permute.xlu0 %584 }
 0x2e5   :  { %1003 = vmatpush3.bf16.msra.mxu1 %v1042_v54 }
 0x2e6   :  { %v587_v10 = vpop.permute.xlu1 %586  ;;  %v589_v32 = vpop.permute.xlu0 %588 }
 0x3a3   :  { %v982_v50 = vpop.f32.mrb[8].mxu0 }
 0x3a4   :  { %v514_v51 = vmul.f32 2.0, %v982_v50  ;;  %v477_v52 = vpop.f32.mrb[9].mxu0 }
 0x3a5   :  { %v512_v55 = vmul.f32 2.0, %v477_v52  ;;  %v983_v56 = vpop.f32.mrb[10].mxu0 }
 0x3a6   :  { %v509_v57 = vpack.c.bf16 %v983_v56, %v982_v50  ;;  %v515_v58 = vmul.f32 2.0, %v983_v56  ;;  %v480_v59 = vpop.f32.mrb[11].mxu0  ;;  %v522_v60 = vsub.f32 %v514_v51, %v1210_v53  ;;  %v566_v61 = vsub.f32 %v514_v51, %v545_v35 }
 0x3a7   :  { %v508_v62 = vpack.c.bf16 %v480_v59, %v477_v52  ;;  %v513_v63 = vmul.f32 2.0, %v480_v59  ;;  %v520_v0 = vsub.f32 %v512_v55, %v1201_v46  ;;  %v564_v3 = vsub.f32 %v512_v55, %v541_v33  ;;  %v591_v33 = vpop.permute.xlu1 %590 }
 0x3a8   :  { %618 = vrot.lane.b32.xlu1 %v509_v57, %s1070_s18  ;;  %v523_v5 = vsub.f32 %v515_v58, %v1206_v48  ;;  %v567_v6 = vsub.f32 %v515_v58, %v547_v36  ;;  %v602_v11 = vsub.f32 %v514_v51, %v581_v39  ;;  %v603_v8 = vsub.f32 %v515_v58, %v583_v40 }
 0x3a9   :  { %616 = vrot.lane.b32.xlu0 %v508_v62, %s1070_s18  ;;  %v521_v53 = vsub.f32 %v513_v63, %v1203_v47  ;;  %v565_v12 = vsub.f32 %v513_v63, %v543_v34  ;;  %v600_v14 = vsub.f32 %v512_v55, %v577_v37  ;;  %v601_v15 = vsub.f32 %v513_v63, %v579_v38 }
 0x3aa   :  { %v529_v46 = vpack.c.bf16 %v523_v5, %v522_v60  ;;  %v573_v16 = vpack.c.bf16 %v567_v6, %v566_v61  ;;  %v609_v18 = vpack.c.bf16 %v603_v8, %v602_v11 }
 0x3ab   :  { %v986_v19 = vpop.f32.mrb[12].mxu0  ;;  %v528_v20 = vpack.c.bf16 %v521_v53, %v520_v0  ;;  %v572_v22 = vpack.c.bf16 %v565_v12, %v564_v3  ;;  %v608_v23 = vpack.c.bf16 %v601_v15, %v600_v14 }
 0x3ac   :  { %v518_v48 = vmul.f32 2.0, %v986_v19  ;;  %630 = vrot.lane.b32.xlu1 %v529_v46, %s1070_s18  ;;  %v493_v25 = vpop.f32.mrb[13].mxu0 }
 0x3ad   :  { %v516_v26 = vmul.f32 2.0, %v493_v25  ;;  %628 = vrot.lane.b32.xlu0 %v528_v20, %s1070_s18  ;;  %v987_v27 = vpop.f32.mrb[14].mxu0 }
 0x3ae   :  { %v511_v28 = vpack.c.bf16 %v987_v27, %v986_v19  ;;  %v519_v47 = vmul.f32 2.0, %v987_v27  ;;  %v496_v29 = vpop.f32.mrb[15].mxu0  ;;  %v526_v30 = vsub.f32 %v518_v48, %v1230_v7  ;;  %v570_v31 = vsub.f32 %v518_v48, %v1318_v45 }
 0x3af   :  { %v510_v34 = vpack.c.bf16 %v496_v29, %v493_v25  ;;  %v517_v35 = vmul.f32 2.0, %v496_v29  ;;  %v524_v36 = vsub.f32 %v516_v26, %v1220_v1  ;;  %v568_v37 = vsub.f32 %v516_v26, %v1308_v41 }
 0x3b0   :  { %642 = vrot.lane.b32.xlu1 %v573_v16, %s1070_s18  ;;  %v527_v38 = vsub.f32 %v519_v47, %v1226_v4  ;;  %v571_v39 = vsub.f32 %v519_v47, %v1320_v49  ;;  %v606_v40 = vsub.f32 %v518_v48, %v589_v32  ;;  %v607_v42 = vsub.f32 %v519_v47, %v591_v33 }
 0x3b1   :  { %v525_v7 = vsub.f32 %v517_v35, %v1222_v2  ;;  %v569_v44 = vsub.f32 %v517_v35, %v1313_v43  ;;  %v605_v45 = vsub.f32 %v517_v35, %v587_v10  ;;  %640 = vrot.lane.b32.xlu0 %v572_v22, %s1070_s18  ;;  %v604_v50 = vsub.f32 %v516_v26, %v585_v9 }
 0x3b2   :  { %v531_v51 = vpack.c.bf16 %v527_v38, %v526_v30  ;;  %v575_v1 = vpack.c.bf16 %v571_v39, %v570_v31  ;;  %v611_v52 = vpack.c.bf16 %v607_v42, %v606_v40 }
 0x3b3   :  { %v530_v41 = vpack.c.bf16 %v525_v7, %v524_v36  ;;  %v574_v54 = vpack.c.bf16 %v569_v44, %v568_v37  ;;  %v610_v55 = vpack.c.bf16 %v605_v45, %v604_v50 }
 0x3b4   :  { %654 = vrot.lane.b32.xlu1 %v609_v18, %s1070_s18 }
 0x3b5   :  { %652 = vrot.lane.b32.xlu0 %v608_v23, %s1070_s18 }
 0x3b8   :  { %622 = vrot.lane.b32.xlu1 %v511_v28, %s1070_s18 }
 0x3b9   :  { %620 = vrot.lane.b32.xlu0 %v510_v34, %s1070_s18 }
 0x3bc   :  { %634 = vrot.lane.b32.xlu1 %v531_v51, %s1070_s18 }
 0x3bd   :  { %632 = vrot.lane.b32.xlu0 %v530_v41, %s1070_s18 }
 0x3c0   :  { %646 = vrot.lane.b32.xlu1 %v575_v1, %s1070_s18 }
 0x3c1   :  { %644 = vrot.lane.b32.xlu0 %v574_v54, %s1070_s18 }
 0x3c4   :  { %658 = vrot.lane.b32.xlu1 %v611_v52, %s1070_s18 }
 0x3c5   :  { %656 = vrot.lane.b32.xlu0 %v610_v55, %s1070_s18 }
 0x41a   :  { %v619_v2 = vpop.permute.xlu1 %618 }
 0x41b   :  { %v617_v4 = vpop.permute.xlu0 %616  ;;  %v663_v59 = vsel %vm85_vm0, %v1263_v17, %v619_v2 }
 0x41c   :  { %v661_v58 = vsel %vm85_vm0, %v1256_v13, %v617_v4 }
 0x41e   :  { %v631_v43 = vpop.permute.xlu1 %630 }
 0x41f   :  { %v629_v49 = vpop.permute.xlu0 %628  ;;  %v672_v62 = vsel %vm668_vm4, %v663_v59, %v631_v43 }
 0x420   :  { %v670_v60 = vsel %vm668_vm4, %v661_v58, %v629_v49 }
 0x422   :  { %v643_v56 = vpop.permute.xlu1 %642 }
 0x423   :  { %v641_v57 = vpop.permute.xlu0 %640  ;;  %v681_v3 = vsel %vm677_vm5, %v672_v62, %v643_v56 }
 0x424   :  { %v679_v63 = vsel %vm677_vm5, %v670_v60, %v641_v57 }
 0x426   :  { %v655_v61 = vpop.permute.xlu1 %654 }
 0x427   :  { %v653_v0 = vpop.permute.xlu0 %652  ;;  %v691_v6 = vsel %vm686_vm6, %v681_v3, %v655_v61 }
 0x428   :  { %v688_v5 = vsel %vm686_vm6, %v679_v63, %v653_v0 }
 0x429   :  { %1004 = vmatprep.mubr.bf16.mxu1 %v688_v5 }
 0x42a   :  { %1005 = vmatmul.mubr.bf16.vlgmr.msra.gmra.mrb[8].mxu1 %v691_v6  ;;  %v623_v13 = vpop.permute.xlu1 %622 }
 0x42b   :  { %v621_v11 = vpop.permute.xlu0 %620  ;;  %v667_v12 = vsel %vm85_vm0, %v1277_v24, %v623_v13 }
 0x42c   :  { %v665_v53 = vsel %vm85_vm0, %v1270_v21, %v621_v11  ;;  %v895_v21 = vld [vmem:[%s1393_s5] ss:$0 sm:$0xff]  ;;  %s1071_s5 = smov [#allocation2]  }
 0x42d   :  { %s856_s1 = sshll.u32 %s1071_s5, 4  ;;  %s857_s1 = int_to_ptr.vmem [resolvable:$true] %s856_s1 }
 0x42e   :  { %v635_v8 = vpop.permute.xlu1 %634  ;;  %s1043_s20 = scalar_lea.vmem %s857_s1, 1024  ;;  %p1048_p1 = scmp.lt.s32.totalorder %s857_s1, %s857_s1 }
 0x42f   :  { %v633_v17 = vpop.permute.xlu0 %632  ;;  %v676_v46 = vsel %vm668_vm4, %v667_v12, %v635_v8  ;;  %p1044_p0 = scmp.ne.s32.totalorder %s857_s1, %s1043_s20  ;;  %p1049_p2 = scmp.lt.s32.totalorder %s1043_s20, %s1043_s20 }
 0x430   :  { %v674_v14 = vsel %vm668_vm4, %v665_v53, %v633_v17 }
 0x431   :  { %p1050_p3 = por %p1049_p2, %p1048_p1 }
 0x432   :  { %v647_v9 = vpop.permute.xlu1 %646 }
 0x433   :  { %v645_v10 = vpop.permute.xlu0 %644  ;;  %v685_v19 = vsel %vm677_vm5, %v676_v46, %v647_v9  ;;  %p1051_p4 = pnand %p1050_p3, %p1044_p0 }
 0x434   :  { %v683_v16 = vsel %vm677_vm5, %v674_v14, %v645_v10 }
 0x436   :  { %v659_v15 = vpop.permute.xlu1 %658 }
 0x437   :  { %v657_v18 = vpop.permute.xlu0 %656  ;;  %v697_v22 = vsel %vm686_vm6, %v685_v19, %v659_v15 }
 0x438   :  { %v694_v20 = vsel %vm686_vm6, %v683_v16, %v657_v18 }
 0x439   :  { %1008 = vmatprep.mubr.bf16.mxu1 %v694_v20 }
 0x43a   :  { %1009 = vmatmul.mubr.bf16.gmra.mrb[12].mxu1 %v697_v22 }
 0x4fd   :  { %v1006_v24 = vpop.f32.mrb[8].mxu1 }
 0x4fe   :  { %v813_v23 = vadd.f32 %v1006_v24, %v895_v21  ;;  %v804_v48 = vpop.f32.mrb[9].mxu1 }
 0x4ff   :  { %v805_v25 = vadd.f32 %v895_v21, %v804_v48  ;;  %v1007_v26 = vpop.f32.mrb[10].mxu1 }
 0x500   :  { %v837_v27 = vmax.f32 %v813_v23, 0.0  ;;  %v816_v28 = vadd.f32 %v1007_v26, %v895_v21  ;;  %v807_v47 = vpop.f32.mrb[11].mxu1 }
 0x501   :  { %v835_v29 = vmax.f32 %v805_v25, 0.0  ;;  %v808_v30 = vadd.f32 %v895_v21, %v807_v47 }
 0x502   :  { %845 = vst [vmem:[#allocation2 + $0x10] sm:$0xff] %v837_v27  ;;  %v838_v31 = vmax.f32 %v816_v28, 0.0 }
 0x503   :  { %843 = vst [vmem:[#allocation2] sm:$0xff] %v835_v29  ;;  %v836_v32 = vmax.f32 %v808_v30, 0.0 }
 0x504   :  { %846 = vst [vmem:[#allocation2 + $0x18] sm:$0xff] %v838_v31 }
 0x505   :  { %844 = vst [vmem:[#allocation2 + $0x8] sm:$0xff] %v836_v32 }
 0x50d   :  { %v1010_v33 = vpop.f32.mrb[12].mxu1 }
 0x50e   :  { %v829_v34 = vadd.f32 %v1010_v33, %v895_v21  ;;  %v820_v35 = vpop.f32.mrb[13].mxu1 }
 0x50f   :  { %v821_v36 = vadd.f32 %v895_v21, %v820_v35  ;;  %v1011_v37 = vpop.f32.mrb[14].mxu1 }
 0x510   :  { %v841_v38 = vmax.f32 %v829_v34, 0.0  ;;  %v832_v39 = vadd.f32 %v1011_v37, %v895_v21  ;;  %v823_v40 = vpop.f32.mrb[15].mxu1 }
 0x511   :  { %v839_v42 = vmax.f32 %v821_v36, 0.0  ;;  %v824_v7 = vadd.f32 %v895_v21, %v823_v40 }
 0x512   :  { %849 = vst [vmem:[#allocation2 + $0x30] sm:$0xff] %v841_v38  ;;  %v842_v44 = vmax.f32 %v832_v39, 0.0 }
 0x513   :  { %847 = vst [vmem:[#allocation2 + $0x20] sm:$0xff] %v839_v42  ;;  %v840_v45 = vmax.f32 %v824_v7, 0.0 }
 0x514   :  { %850 = vst [vmem:[#allocation2 + $0x38] sm:$0xff] %v842_v44 }
 0x515   :  { %848 = vst [vmem:[#allocation2 + $0x28] sm:$0xff] %v840_v45 }
 0x516   :  { %1054 = shalt.err (!%p1051_p4)
}
 0x517   :  { %s1055_s23 = scalar_lea.hbm %s1394_s6, 1024 }
 0x518   :  { %p1056_p5 = scmp.ne.s32.totalorder %s1394_s6, %s1055_s23  ;;  %p1059_p6 = scmp.lt.u32.totalorder %s1055_s23, %s1394_s6 }
 0x51a   :  { %p1061_p7 = pnand %p1059_p6, %p1056_p5 }
 0x51c   :  { %1064 = shalt.err (!%p1061_p7)
}
 0x51d   :  { %s1072_s28 = smov 128   ;;  %s1073_s29 = smov 8  }
 0x51e   :  { %862 = dma.vmem_to_hbm [thread:$0]  %s857_s1, 1024, %s1394_s6, [#allocation3], %s1072_s28, %s1072_s28, %s1073_s29  }
 0x51f   :  { %1065 = dma.done.wait [#allocation3], 1024  }
 0x520   :  { %1066 = vsyncadd [#allocation3], 4294966272 }
 0x521   :  { %866 = vsyncpa [#allocation3], 1 }

</bundles_post_ra>
